<compile_context>
chip_gen: v7x
topology: tpu7x:2x2x1
jax: 0.10.0
libtpu: 0.0.40
codegen_flags: <defaults>
</compile_context>

<pallas_src>
import math
import functools

import jax
import jax.numpy as jnp
from jax.experimental import pallas as pl
from jax.experimental.pallas import tpu as pltpu


def _round_up(x, m):
    return ((x + m - 1) // m) * m


# ---------------------------------------------------------------------------
# Fused kernel.  Grid = (batch, query-row tile).
# ---------------------------------------------------------------------------
def _cross_attention_kernel(qq_ref, seg_ref, w_ref, b_ref, mask_ref,
                            oo_ref, ctx_ref, *,
                            C_p, scale, M_real, M_pad, ctx_once):
    # qq_ref  : (1, tile_q, C_p)  bf16   stacked [q1 ; q2] rows
    # seg_ref : (1, M_p, C_p)     bf16
    # w_ref   : (C_p, 2*C_p)      bf16   b_ref : (1, 2*C_p) f32
    # mask_ref: (C_p, C_p)        f32    additive block-diagonal head mask
    # oo_ref  : (1, tile_q, C_p)  out dtype
    # ctx_ref : (C_p, C_p)        bf16   VMEM scratch (persists across tiles)
    f32, bf16 = jnp.float32, jnp.bfloat16

    def compute_ctx():
        # kv3 projection on the MXU: (M_p, C_p) @ (C_p, 2*C_p), f32 accumulate.
        kv = jnp.dot(seg_ref[0], w_ref[...], preferred_element_type=f32)
        kv = kv + b_ref[...]
        if M_pad != M_real:
            # Padded segfeature rows must not contribute (bias would leak).
            rows = jax.lax.broadcasted_iota(jnp.int32, kv.shape, 0)
            kv = jnp.where(rows < M_real, kv, 0.0)
        # Fold the attention scale into k (M_p*C_p elems < C_p^2), then cast.
        k = (kv[:, :C_p] * scale).astype(bf16)      # lane-aligned slices
        v = kv[:, C_p:].astype(bf16)
        # S[i, j] = sum_m K[m, i] * V[m, j]  (contract the M axis of both).
        s = jax.lax.dot_general(
            k, v, dimension_numbers=(((0,), (0,)), ((), ())),
            preferred_element_type=f32)              # (C_p, C_p)
        # Precomputed additive block-diagonal head mask (0 on-block, -1e30 off).
        s = s + mask_ref[...]
        # Column softmax in f32 (== torch softmax(dim=-2) per head block).
        s_max = jnp.max(s, axis=0, keepdims=True)
        e = jnp.exp(s - s_max)
        denom = jnp.sum(e, axis=0, keepdims=True)
        ctx_ref[...] = (e * pl.reciprocal(denom, approx=True)).astype(bf16)

    if ctx_once:
        # q-tile axis is sequential ("arbitrary"): compute ctx once per batch.
        pl.when(pl.program_id(1) == 0)(compute_ctx)
    else:
        # q-tile axis is "parallel" (B == 1 megacore split): recompute per tile.
        compute_ctx()

    # Both query branches at once: rows = [q1 tile ; q2 tile] stacked.
    oo_ref[0] = jnp.dot(qq_ref[0], ctx_ref[...],
                        preferred_element_type=f32).astype(oo_ref.dtype)


# ---------------------------------------------------------------------------
# Wrapper: bf16 + lane/sublane padding, q1/q2 stacking, pallas_call.
# ---------------------------------------------------------------------------
@functools.partial(jax.jit,
                   static_argnames=("num_heads", "out_dtype", "tile_q_target"))
def cross_attention(x1, x2, segfeature, w_kv, b_kv, *, num_heads,
                    out_dtype=jnp.bfloat16, tile_q_target=256):
    B, N, C = x1.shape
    Bs, M, Cs = segfeature.shape
    assert Bs == B and Cs == C and C % num_heads == 0
    head_dim = C // num_heads
    scale = head_dim ** (-0.5)
    bf16 = jnp.bfloat16

    C_p = _round_up(C, 128)          # lane-dense channel dim
    N_p = _round_up(N, 8)            # sublane-aligned query length
    M_p = _round_up(M, 8)            # sublane-aligned key/value length

    # Stack q1/q2 along rows so both branches are one MXU matmul per tile.
    x1p = jnp.pad(x1.astype(bf16), ((0, 0), (0, N_p - N), (0, C_p - C)))
    x2p = jnp.pad(x2.astype(bf16), ((0, 0), (0, N_p - N), (0, C_p - C)))
    qq = jnp.concatenate([x1p, x2p], axis=1)               # (B, 2*N_p, C_p)
    rows = 2 * N_p
    tile_q = rows if rows <= tile_q_target else tile_q_target
    rows_p = _round_up(rows, tile_q)
    if rows_p != rows:
        qq = jnp.pad(qq, ((0, 0), (0, rows_p - rows), (0, 0)))
    n_q_tiles = rows_p // tile_q

    segp = jnp.pad(segfeature.astype(bf16),
                   ((0, 0), (0, M_p - M), (0, C_p - C)))

    # Repack kv3 weight/bias: K -> output lanes [0, C_p), V -> [C_p, 2*C_p).
    # Phantom channels get zero weight/bias => phantom head blocks output 0
    # once multiplied by the zero-padded query columns.
    w_p = jnp.zeros((C_p, 2 * C_p), jnp.float32)
    w_p = w_p.at[:C, :C].set(w_kv[:, :C]).at[:C, C_p:C_p + C].set(w_kv[:, C:])
    w_p = w_p.astype(bf16)
    b_p = jnp.zeros((1, 2 * C_p), jnp.float32)
    b_p = b_p.at[0, :C].set(b_kv[:C]).at[0, C_p:C_p + C].set(b_kv[C:])

    # Precomputed additive block-diagonal head mask (hoisted out of the kernel).
    blk = jnp.arange(C_p, dtype=jnp.int32) // head_dim
    mask = jnp.where(blk[:, None] == blk[None, :], 0.0, -1e30).astype(jnp.float32)

    # ctx cached across q tiles unless B == 1 needs the q-tile axis parallel
    # (v7x megacore: guarantee >= 2 independent parallel units when possible).
    ctx_once = (B > 1) or (n_q_tiles == 1)
    dim_sem = ("parallel", "arbitrary") if ctx_once else ("parallel", "parallel")

    # Scoped-VMEM budget from the actual block shapes (+ headroom for temps).
    out_isize = jnp.dtype(out_dtype).itemsize
    blk_bytes = (
        2 * (tile_q * C_p * 2)            # qq block (double-buffered)
        + 2 * (M_p * C_p * 2)             # seg block
        + 2 * (C_p * 2 * C_p * 2)         # weight
        + 2 * (2 * C_p * 4)               # bias
        + 2 * (C_p * C_p * 4)             # mask
        + 2 * (tile_q * C_p * out_isize)  # output block
        + C_p * C_p * 2                   # ctx scratch
        + M_p * 2 * C_p * 4               # kv intermediate
        + 4 * C_p * C_p * 4               # s / exp / softmax temporaries
    )
    vmem_limit = int(min(60 * 1024 * 1024, max(32 * 1024 * 1024, 2 * blk_bytes)))

    kernel = functools.partial(
        _cross_attention_kernel,
        C_p=C_p, scale=scale, M_real=M, M_pad=M_p, ctx_once=ctx_once)

    oo = pl.pallas_call(
        kernel,
        out_shape=jax.ShapeDtypeStruct((B, rows_p, C_p), out_dtype),
        grid_spec=pltpu.PrefetchScalarGridSpec(
            num_scalar_prefetch=0,
            grid=(B, n_q_tiles),
            in_specs=[
                pl.BlockSpec((1, tile_q, C_p), lambda b, t: (b, t, 0)),   # qq
                pl.BlockSpec((1, M_p, C_p), lambda b, t: (b, 0, 0)),      # seg
                pl.BlockSpec((C_p, 2 * C_p), lambda b, t: (0, 0)),        # w
                pl.BlockSpec((1, 2 * C_p), lambda b, t: (0, 0)),          # b
                pl.BlockSpec((C_p, C_p), lambda b, t: (0, 0)),            # mask
            ],
            out_specs=pl.BlockSpec((1, tile_q, C_p), lambda b, t: (b, t, 0)),
            scratch_shapes=[pltpu.VMEM((C_p, C_p), jnp.bfloat16)],
        ),
        compiler_params=pltpu.CompilerParams(
            dimension_semantics=dim_sem,
            vmem_limit_bytes=vmem_limit),
    )(qq, segp, w_p, b_p, mask)

    o1 = oo[:, :N, :C]
    o2 = oo[:, N_p:N_p + N, :C]
    return o1, o2


# ---------------------------------------------------------------------------
# Pure-JAX reference mirroring the PyTorch module exactly.
#   mixed=True casts matmul operands to bf16 at roughly the same points as the
#   kernel so the comparison isolates structural bugs from bf16 rounding.
# ---------------------------------------------------------------------------
def cross_attention_ref(x1, x2, seg, w_kv, b_kv, num_heads, *, mixed=False):
    B, N, C = x1.shape
    M = seg.shape[1]
    D = C // num_heads
    scale = D ** (-0.5)
    cast = (lambda t: t.astype(jnp.bfloat16)) if mixed else (lambda t: t)
    prec = None if mixed else jax.lax.Precision.HIGHEST

    kv = jnp.einsum("bmc,cd->bmd", cast(seg), cast(w_kv),
                    preferred_element_type=jnp.float32, precision=prec) + b_kv
    kv = kv.reshape(B, M, 2, num_heads, D).transpose(2, 0, 3, 1, 4)
    k3, v3 = kv[0], kv[1]                                       # (B, H, M, D)

    ctx = jnp.einsum("bhmi,bhmj->bhij", cast(k3), cast(v3),
                     preferred_element_type=jnp.float32, precision=prec) * scale
    ctx = jax.nn.softmax(ctx, axis=-2)                          # (B, H, D, D)

    q1 = x1.reshape(B, N, num_heads, D).transpose(0, 2, 1, 3)   # (B, H, N, D)
    q2 = x2.reshape(B, N, num_heads, D).transpose(0, 2, 1, 3)
    o1 = jnp.einsum("bhnd,bhde->bhne", cast(q1), cast(ctx),
                    preferred_element_type=jnp.float32, precision=prec)
    o2 = jnp.einsum("bhnd,bhde->bhne", cast(q2), cast(ctx),
                    preferred_element_type=jnp.float32, precision=prec)
    o1 = o1.transpose(0, 2, 1, 3).reshape(B, N, C)
    o2 = o2.transpose(0, 2, 1, 3).reshape(B, N, C)
    return o1, o2


if __name__ == "__main__":
    key = jax.random.PRNGKey(0)
    B, N, M = 2, 16, 12          # query length 16, segfeature length 12 (tests padding)
    C, num_heads = 64, 8         # head_dim = 8

    k1, k2, k3, kw, kb = jax.random.split(key, 5)
    x1 = jax.random.normal(k1, (B, N, C), jnp.float32)
    x2 = jax.random.normal(k2, (B, N, C), jnp.float32)
    seg = jax.random.normal(k3, (B, M, C), jnp.float32)

    # nn.Linear(dim, 2*dim) default init; stored as (in, out) = W_torch.T.
    bound = 1.0 / math.sqrt(C)
    w_kv = jax.random.uniform(kw, (C, 2 * C), jnp.float32, -bound, bound)
    # Exercising qkv_bias=True path (set b_kv to zeros for qkv_bias=False).
    b_kv = jax.random.uniform(kb, (2 * C,), jnp.float32, -bound, bound)

    o1, o2 = cross_attention(x1, x2, seg, w_kv, b_kv, num_heads=num_heads)
    o1, o2 = jax.block_until_ready((o1, o2))
    o1f, o2f = o1.astype(jnp.float32), o2.astype(jnp.float32)

    # Check vs bf16-matched reference (catches structural / head-blocking bugs;
    # tolerance covers bf16 output store + approx-reciprocal rounding).
    r1m, r2m = cross_attention_ref(x1, x2, seg, w_kv, b_kv, num_heads, mixed=True)
    err_m = max(float(jnp.max(jnp.abs(o1f - r1m))), float(jnp.max(jnp.abs(o2f - r2m))))
    assert err_m < 6e-2, f"mismatch vs bf16-matched reference: {err_m}"

    # Loose check vs full-f32 reference (bounds overall bf16 rounding).
    r1, r2 = cross_attention_ref(x1, x2, seg, w_kv, b_kv, num_heads, mixed=False)
    err_f = max(float(jnp.max(jnp.abs(o1f - r1))), float(jnp.max(jnp.abs(o2f - r2))))
    assert err_f < 1e-1, f"mismatch vs f32 reference: {err_f}"

    assert o1.shape == (B, N, C) and o2.shape == (B, N, C)
    assert bool(jnp.all(jnp.isfinite(o1f))) and bool(jnp.all(jnp.isfinite(o2f)))
    print("KERNEL_OK")
</pallas_src>

<mosaic_0001>
module attributes {stable_mosaic.version = 11 : i64} {
  func.func @_cross_attention_kernel(%arg0: i32, %arg1: i32, %arg2: memref<1x32x128xbf16, #tpu.memory_space<vmem>>, %arg3: memref<1x16x128xbf16, #tpu.memory_space<vmem>>, %arg4: memref<128x256xbf16, #tpu.memory_space<vmem>>, %arg5: memref<1x256xf32, #tpu.memory_space<vmem>>, %arg6: memref<128x128xf32, #tpu.memory_space<vmem>>, %arg7: memref<1x32x128xbf16, #tpu.memory_space<vmem>>, %arg8: memref<128x128xbf16, #tpu.memory_space<vmem>>) attributes {dimension_semantics = [#tpu.dimension_semantics<parallel>, #tpu.dimension_semantics<arbitrary>], iteration_bounds = array<i64: 2, 1>, scalar_prefetch = 0 : i64, scratch_operands = 1 : i64, tpu.core_type = #tpu.core_type<tc>, window_params = [{transform_indices = @transform_0, window_bounds = array<i64: 1, 32, 128>}, {transform_indices = @transform_1, window_bounds = array<i64: 1, 16, 128>}, {pipeline_mode = #tpu.pipeline_mode<synchronous>, transform_indices = @transform_2, window_bounds = array<i64: 128, 256>}, {pipeline_mode = #tpu.pipeline_mode<synchronous>, transform_indices = @transform_3, window_bounds = array<i64: 1, 256>}, {pipeline_mode = #tpu.pipeline_mode<synchronous>, transform_indices = @transform_4, window_bounds = array<i64: 128, 128>}, {transform_indices = @transform_5, window_bounds = array<i64: 1, 32, 128>}]} {
    %c0_i32 = arith.constant 0 : i32
    %0 = arith.cmpi eq, %arg1, %c0_i32 : i32
    %1 = arith.extui %0 : i1 to i32
    %c0_i32_0 = arith.constant 0 : i32
    %2 = arith.cmpi ne, %1, %c0_i32_0 : i32
    scf.if %2 {
      %c0_8 = arith.constant 0 : index
      %c0_9 = arith.constant 0 : index
      %c0_10 = arith.constant 0 : index
      %11 = vector.load %arg3[%c0_8, %c0_9, %c0_10] : memref<1x16x128xbf16, #tpu.memory_space<vmem>>, vector<1x16x128xbf16>
      %12 = vector.shape_cast %11 : vector<1x16x128xbf16> to vector<16x128xbf16>
      %c0_11 = arith.constant 0 : index
      %c0_12 = arith.constant 0 : index
      %13 = vector.load %arg4[%c0_11, %c0_12] : memref<128x256xbf16, #tpu.memory_space<vmem>>, vector<128x256xbf16>
      %cst_13 = arith.constant dense<0.000000e+00> : vector<16x256xf32>
      %14 = tpu.matmul %12, %13, %cst_13 {dimension_numbers = #tpu.dot_dimension_numbers<[1], [0], [0], [1], [0, 0, 1, 1], [], []>} : vector<16x128xbf16>, vector<128x256xbf16>, vector<16x256xf32> -> vector<16x256xf32>
      %c0_14 = arith.constant 0 : index
      %c0_15 = arith.constant 0 : index
      %15 = vector.load %arg5[%c0_14, %c0_15] : memref<1x256xf32, #tpu.memory_space<vmem>>, vector<1x256xf32>
      %16 = vector.broadcast %15 : vector<1x256xf32> to vector<16x256xf32>
      %17 = arith.addf %14, %16 : vector<16x256xf32>
      %18 = tpu.iota {dimensions = array<i32: 0>} : vector<16x256xi32>
      %c12_i32 = arith.constant 12 : i32
      %19 = vector.broadcast %c12_i32 : i32 to vector<16x256xi32>
      %20 = arith.cmpi slt, %18, %19 : vector<16x256xi32>
      %cst_16 = arith.constant 0.000000e+00 : f32
      %21 = vector.broadcast %cst_16 : f32 to vector<16x256xf32>
      %22 = arith.select %20, %17, %21 : vector<16x256xi1>, vector<16x256xf32>
      %23 = vector.extract_strided_slice %22 {offsets = [0, 0], sizes = [16, 128], strides = [1, 1]} : vector<16x256xf32> to vector<16x128xf32>
      %cst_17 = arith.constant 0.353553385 : f32
      %24 = vector.broadcast %cst_17 : f32 to vector<16x128xf32>
      %25 = arith.mulf %23, %24 : vector<16x128xf32>
      %26 = arith.truncf %25 : vector<16x128xf32> to vector<16x128xbf16>
      %27 = vector.extract_strided_slice %22 {offsets = [0, 128], sizes = [16, 128], strides = [1, 1]} : vector<16x256xf32> to vector<16x128xf32>
      %28 = arith.truncf %27 : vector<16x128xf32> to vector<16x128xbf16>
      %cst_18 = arith.constant dense<0.000000e+00> : vector<128x128xf32>
      %29 = tpu.matmul %26, %28, %cst_18 {dimension_numbers = #tpu.dot_dimension_numbers<[0], [0], [1], [1], [0, 1, 1, 1], [], []>} : vector<16x128xbf16>, vector<16x128xbf16>, vector<128x128xf32> -> vector<128x128xf32>
      %c0_19 = arith.constant 0 : index
      %c0_20 = arith.constant 0 : index
      %30 = vector.load %arg6[%c0_19, %c0_20] : memref<128x128xf32, #tpu.memory_space<vmem>>, vector<128x128xf32>
      %31 = arith.addf %29, %30 : vector<128x128xf32>
      %cst_21 = arith.constant dense<0xFF800000> : vector<128xf32>
      %32 = vector.multi_reduction <maximumf>, %31, %cst_21 [0] : vector<128x128xf32> to vector<128xf32>
      %33 = vector.shape_cast %32 : vector<128xf32> to vector<1x128xf32>
      %34 = vector.broadcast %33 : vector<1x128xf32> to vector<128x128xf32>
      %35 = arith.subf %31, %34 : vector<128x128xf32>
      %36 = math.exp %35 : vector<128x128xf32>
      %cst_22 = arith.constant dense<0.000000e+00> : vector<128xf32>
      %37 = vector.multi_reduction <add>, %36, %cst_22 [0] : vector<128x128xf32> to vector<128xf32>
      %38 = vector.shape_cast %37 : vector<128xf32> to vector<1x128xf32>
      %39 = tpu.reciprocal %38 {approx = true} : vector<1x128xf32> -> vector<1x128xf32>
      %40 = vector.broadcast %39 : vector<1x128xf32> to vector<128x128xf32>
      %41 = arith.mulf %36, %40 : vector<128x128xf32>
      %42 = arith.truncf %41 : vector<128x128xf32> to vector<128x128xbf16>
      %c0_23 = arith.constant 0 : index
      %c0_24 = arith.constant 0 : index
      %43 = vector.load %arg8[%c0_23, %c0_24] : memref<128x128xbf16, #tpu.memory_space<vmem>>, vector<128x128xbf16>
      tpu.vector_store %arg8[%c0_23, %c0_24], %42 {strides = array<i32>} : memref<128x128xbf16, #tpu.memory_space<vmem>>, vector<128x128xbf16>,
    } else {
    }
    %c0 = arith.constant 0 : index
    %c0_1 = arith.constant 0 : index
    %c0_2 = arith.constant 0 : index
    %3 = vector.load %arg2[%c0, %c0_1, %c0_2] : memref<1x32x128xbf16, #tpu.memory_space<vmem>>, vector<1x32x128xbf16>
    %4 = vector.shape_cast %3 : vector<1x32x128xbf16> to vector<32x128xbf16>
    %c0_3 = arith.constant 0 : index
    %c0_4 = arith.constant 0 : index
    %5 = vector.load %arg8[%c0_3, %c0_4] : memref<128x128xbf16, #tpu.memory_space<vmem>>, vector<128x128xbf16>
    %cst = arith.constant dense<0.000000e+00> : vector<32x128xf32>
    %6 = tpu.matmul %4, %5, %cst {dimension_numbers = #tpu.dot_dimension_numbers<[1], [0], [0], [1], [0, 0, 1, 1], [], []>} : vector<32x128xbf16>, vector<128x128xbf16>, vector<32x128xf32> -> vector<32x128xf32>
    %7 = arith.truncf %6 : vector<32x128xf32> to vector<32x128xbf16>
    %c0_5 = arith.constant 0 : index
    %c0_6 = arith.constant 0 : index
    %c0_7 = arith.constant 0 : index
    %8 = vector.load %arg7[%c0_5, %c0_6, %c0_7] : memref<1x32x128xbf16, #tpu.memory_space<vmem>>, vector<1x32x128xbf16>
    %9 = vector.shape_cast %8 : vector<1x32x128xbf16> to vector<32x128xbf16>
    %10 = vector.shape_cast %7 : vector<32x128xbf16> to vector<1x32x128xbf16>
    tpu.vector_store %arg7[%c0_5, %c0_6, %c0_7], %10 {strides = array<i32>} : memref<1x32x128xbf16, #tpu.memory_space<vmem>>, vector<1x32x128xbf16>,
    return
  }
  func.func @transform_0(%arg0: i32, %arg1: i32) -> (i32, i32, i32) {
    %c0_i32 = arith.constant 0 : i32
    %c0_i32_0 = arith.constant 0 : i32
    return %arg0, %arg1, %c0_i32 : i32, i32, i32
  }
  func.func @transform_1(%arg0: i32, %arg1: i32) -> (i32, i32, i32) {
    %c0_i32 = arith.constant 0 : i32
    %c0_i32_0 = arith.constant 0 : i32
    %c0_i32_1 = arith.constant 0 : i32
    return %arg0, %c0_i32, %c0_i32_0 : i32, i32, i32
  }
  func.func @transform_2(%arg0: i32, %arg1: i32) -> (i32, i32) {
    %c0_i32 = arith.constant 0 : i32
    %c0_i32_0 = arith.constant 0 : i32
    %c0_i32_1 = arith.constant 0 : i32
    return %c0_i32, %c0_i32_0 : i32, i32
  }
  func.func @transform_3(%arg0: i32, %arg1: i32) -> (i32, i32) {
    %c0_i32 = arith.constant 0 : i32
    %c0_i32_0 = arith.constant 0 : i32
    %c0_i32_1 = arith.constant 0 : i32
    return %c0_i32, %c0_i32_0 : i32, i32
  }
  func.func @transform_4(%arg0: i32, %arg1: i32) -> (i32, i32) {
    %c0_i32 = arith.constant 0 : i32
    %c0_i32_0 = arith.constant 0 : i32
    %c0_i32_1 = arith.constant 0 : i32
    return %c0_i32, %c0_i32_0 : i32, i32
  }
  func.func @transform_5(%arg0: i32, %arg1: i32) -> (i32, i32, i32) {
    %c0_i32 = arith.constant 0 : i32
    %c0_i32_0 = arith.constant 0 : i32
    return %arg0, %arg1, %c0_i32 : i32, i32, i32
  }
}

</mosaic_0001>

<bundles_post_ra>
// kernel: cross_attention.1
= control target key start
LH: loop header
LB: loop body
LE: loop exit
PB: predicated region body
PF: predicated region fallthrough
CT: control target
= control target key end

     0   :  { %s1195_s18 = smov 0   ;;  %s1197_s19 = smov 0   ;;  %s1414_s0 = inlined_call_operand.vmem [shape: bf16[2,32,128], index: 0, kind: input, shape index: {}]   ;;  %s1415_s1 = inlined_call_operand.vmem [shape: bf16[2,16,128], index: 1, kind: input, shape index: {}]   ;;  %s1416_s2 = inlined_call_operand.vmem [shape: bf16[128,256], index: 2, kind: input, shape index: {}]   ;;  %s1417_s3 = inlined_call_operand.vmem [shape: f32[1,256], index: 3, kind: input, shape index: {}]   ;;  %s1418_s4 = inlined_call_operand.vmem [shape: f32[128,128], index: 4, kind: input, shape index: {}]   ;;  %s1419_s5 = inlined_call_operand.vmem [shape: bf16[2,32,128], index: 5, kind: output, shape index: {}]  }
   0x1   :  { %s1199_s20 = smov 0  }
   0x2 LB: > { %s27_s21 = sadd.s32 1, %s1157_s19  ;;  %p934_p0 = scmp.ge.s32.totalorder %s1161_s20, 1  ;;  %s1161_s20 = sphi %s1199_s20, %s15_s20   ;;  %s1157_s19 = sphi %s1197_s19, %s1421_s19   ;;  %s1153_s18 = sphi %s1195_s18, %s1420_s18  }
   0x3   : > { %p29_p1 = scmp.ge.s32.totalorder %s27_s21, 2  ;;  %p218_p2 = scmp.lt.s32.totalorder %s1161_s20, 3 }
   0x5   : > { %s1423_s21 = smov (%p29_p1, %s27_s21), 0  ;;  %p219_p3 = pnand %p934_p0, %p218_p2 }
   0x6   : > { %v1078_v0 = vld [vmem:[%s1416_s2 + $0x4] ss:$8 sps:$4 sm:$0xff] (!%p219_p3)   ;;  %p260_p4 = scmp.lt.s32.totalorder (!%p219_p3), %s1153_s18, 1  ;;  %v1080_v1 = vld [vmem:[%s1416_s2] ss:$8 sps:$4 sm:$0xff] (!%p219_p3)   ;;  %v1163_v2 = vmov (!%p219_p3), 0   ;;  %v309_v18 = vlaneseq (!%p219_p3) }
   0x7   : > { %222 = sbr.rel (%p219_p3) target bundleno = 951 (0x3b7), region = 40  ;;  %437 = vmatprep.mubr.bf16.mxu0 (!%p219_p3), %v1163_v2  ;;  %405 = vmatprep.subr.bf16.mxu0 (!%p219_p3), %v1078_v0  ;;  %v1081_v3 = vld [vmem:[%s1416_s2 + $0x14] ss:$8 sps:$4 sm:$0xff] (!%p219_p3)   ;;  %v1083_v4 = vld [vmem:[%s1416_s2 + $0x10] ss:$8 sps:$4 sm:$0xff] (!%p219_p3)   ;;  %vm1164_vm1 = vmmov (!%p219_p3), 1  }
   0x8   : > { %406 = vmatpush1.bf16.msra.mxu0 (!%p219_p3), %v1080_v1  ;;  %v1084_v5 = vld [vmem:[%s1416_s2 + $0x24] ss:$8 sps:$4 sm:$0xff] (!%p219_p3)   ;;  %v1086_v6 = vld [vmem:[%s1416_s2 + $0x20] ss:$8 sps:$4 sm:$0xff] (!%p219_p3)   ;;  %v1087_v7 = vld [vmem:[%s1416_s2 + $0x34] ss:$8 sps:$4 sm:$0xff] (!%p219_p3)  }
   0x9   : > { %407 = vmatprep.subr.bf16.mxu0 (!%p219_p3), %v1081_v3  ;;  %v1089_v8 = vld [vmem:[%s1416_s2 + $0x30] ss:$8 sps:$4 sm:$0xff] (!%p219_p3)   ;;  %v1090_v9 = vld [vmem:[%s1416_s2 + $0x44] ss:$8 sps:$4 sm:$0xff] (!%p219_p3)   ;;  %v1092_v10 = vld [vmem:[%s1416_s2 + $0x40] ss:$8 sps:$4 sm:$0xff] (!%p219_p3)  }
   0xa   : > { %v1093_v11 = vld [vmem:[%s1416_s2 + $0x54] ss:$8 sps:$4 sm:$0xff] (!%p219_p3)   ;;  %v1095_v12 = vld [vmem:[%s1416_s2 + $0x50] ss:$8 sps:$4 sm:$0xff] (!%p219_p3)   ;;  %v1096_v13 = vld [vmem:[%s1416_s2 + $0x64] ss:$8 sps:$4 sm:$0xff] (!%p219_p3)  }
   0xb   : > { %v1098_v14 = vld [vmem:[%s1416_s2 + $0x60] ss:$8 sps:$4 sm:$0xff] (!%p219_p3)   ;;  %v1099_v15 = vld [vmem:[%s1416_s2 + $0x74] ss:$8 sps:$4 sm:$0xff] (!%p219_p3)   ;;  %v1101_v16 = vld [vmem:[%s1416_s2 + $0x70] ss:$8 sps:$4 sm:$0xff] (!%p219_p3)  }
   0xc   : > { %408 = vmatpush1.bf16.msra.mxu0 (!%p219_p3), %v1083_v4  ;;  %v310_v19 = vshrl.u32 (!%p219_p3), %v309_v18, 7  ;;  %v307_v21 = vld [vmem:[%s1417_s3] sm:$0x3] (!%p219_p3)  ;;  %vm493_vm3 = vcmask (!%p219_p3), 130048   ;;  %v463_v51 = vld [vmem:[%s1418_s4 + $0x10] sm:$0xff] (!%p219_p3)  ;;  %v464_v55 = vld [vmem:[%s1418_s4 + $0x18] sm:$0xff] (!%p219_p3) }
   0xd   : > { %409 = vmatprep.subr.bf16.mxu0 (!%p219_p3), %v1084_v5  ;;  %v467_v52 = vld [vmem:[%s1418_s4 + $0x30] sm:$0xff] (!%p219_p3)  ;;  %v461_v53 = vld [vmem:[%s1418_s4] sm:$0xff] (!%p219_p3)  ;;  %v468_v57 = vld [vmem:[%s1418_s4 + $0x38] sm:$0xff] (!%p219_p3) }
   0xe   : > { %s1425_s18 = smov (!%p260_p4, %s1153_s18), 1  ;;  %v311_v20 = vsub.s32 0, %v310_v19  ;;  %v315_v22 = vsub.s32 1, %v310_v19  ;;  %v450_v24 = vadd.s32 8, %v310_v19  ;;  %v465_v54 = vld [vmem:[%s1418_s4 + $0x20] sm:$0xff]  ;;  %v462_v59 = vld [vmem:[%s1418_s4 + $0x8] sm:$0xff] }
   0xf   : > { %s978_s7 = sshll.u32 %s1425_s18, 3  ;;  %v466_v62 = vld [vmem:[%s1418_s4 + $0x28] sm:$0xff]  ;;  %s977_s27 = sshll.u32 %s1425_s18, 4 }
  0x10   : > { %s273_s14 = scalar_lea.vmem %s1415_s1, %s978_s7  ;;  %410 = vmatpush1.bf16.msra.mxu0 %v1086_v6  ;;  %v312_v23 = vrot.slane %v307_v21, %v311_v20  ;;  %v316_v26 = vrot.slane %v307_v21, %v315_v22  ;;  %vm452_vm0 = vcmp.lt.s32.totalorder %v450_v24, 12  ;;  %s1370_s7 = scalar_lea.vmem %s1414_s0, %s977_s27 }
  0x11   : > { %411 = vmatprep.subr.bf16.mxu0 %v1087_v7  ;;  %v1102_v17 = vld [vmem:[%s273_s14] sm:$0xff]   ;;  %vm958_vm2 = vmpackc.low %vm452_vm0, %vm1164_vm1  ;;  %s282_s10 = scalar_lea.vmem %s1419_s5, %s977_s27 }
  0x14   : > { %412 = vmatpush1.bf16.msra.mxu0 %v1089_v8 }
  0x15   : > { %413 = vmatprep.subr.bf16.mxu0 %v1090_v9 }
  0x18   : > { %414 = vmatpush1.bf16.msra.mxu0 %v1092_v10 }
  0x19   : > { %415 = vmatprep.subr.bf16.mxu0 %v1093_v11  ;;  %v471_v11 = vld [vmem:[%s1418_s4 + $0x50] sm:$0xff] }
  0x1c   : > { %416 = vmatpush1.bf16.msra.mxu0 %v1095_v12  ;;  %v469_v12 = vld [vmem:[%s1418_s4 + $0x40] sm:$0xff] }
  0x1d   : > { %417 = vmatprep.subr.bf16.mxu0 %v1096_v13 }
  0x20   : > { %418 = vmatpush1.bf16.msra.mxu0 %v1098_v14  ;;  %v472_v14 = vld [vmem:[%s1418_s4 + $0x58] sm:$0xff] }
  0x21   : > { %419 = vmatprep.subr.bf16.mxu0 %v1099_v15 }
  0x24   : > { %420 = vmatpush1.bf16.msra.mxu0 %v1101_v16 }
  0x27   : > { %438 = vmatmul.mubr.bf16.vlgmr.msra.gmra.mrb[0].mxu0 %v1102_v17  ;;  %v470_v17 = vld [vmem:[%s1418_s4 + $0x48] sm:$0xff] }
  0xfa   : > { %v439_v25 = vpop.f32.mrb[0].mxu0 }
  0xfb   : > { %v441_v27 = vpop.f32.mrb[1].mxu0  ;;  %v440_v28 = vadd.f32 %v439_v25, %v312_v23 }
  0xfc   : > { %v443_v29 = vpop.f32.mrb[2].mxu0  ;;  %v442_v32 = vadd.f32 %v441_v27, %v316_v26  ;;  %v475_v27 = vld [vmem:[%s1418_s4 + $0x70] sm:$0xff] }
  0xfd   : > { %v444_v30 = vadd.f32 %v443_v29, %v312_v23  ;;  %v445_v31 = vpop.f32.mrb[3].mxu0  ;;  %v457_v35 = vmul.f32 0.35355338, %v440_v28  ;;  %v473_v28 = vld [vmem:[%s1418_s4 + $0x60] sm:$0xff] }
  0xfe   : > { %v446_v33 = vadd.f32 %v445_v31, %v316_v26 }
  0xff   : > { %v455_v34 = vsel %vm452_vm0, %v444_v30, 0.0  ;;  %v476_v30 = vld [vmem:[%s1418_s4 + $0x78] sm:$0xff] }
 0x100   : > { %v959_v36 = vpack.c.bf16 %v446_v33, %v442_v32  ;;  %v458_v37 = vmul.f32 0.35355338, %v455_v34  ;;  %v474_v33 = vld [vmem:[%s1418_s4 + $0x68] sm:$0xff] }
 0x102   : > { %1014 = vmatprep.subr.msk.bf16.mxu1 %vm958_vm2, %v959_v36  ;;  %v459_v38 = vpack.c.bf16 %v458_v37, %v457_v35 }
 0x103   : > { %1015 = vmatpush3.bf16.msk.msra.mxu1 %vm958_vm2, %v959_v36  ;;  %v1103_v36 = vld [vmem:[%s1370_s7] sm:$0xff]  }
 0x104   : > { %477 = vxpose.xlu0.c.b16.start.end [1/1] (short) %v459_v38, 128 }
 0x16a   : > { %v485_v39 = vpop.trf.xlu0 }
 0x16b   : > { %1016 = vmatprep.mubr.msk.bf16.mxu1 %vm493_vm3, %v485_v39 }
 0x16e   : > { %v486_v40 = vpop.trf.xlu0 }
 0x16f   : > { %1017 = vmatmul.mubr.msk.bf16.vlgmr.msra.gmra.mrb[0].mxu1 %vm493_vm3, %v486_v40 }
 0x172   : > { %v487_v41 = vpop.trf.xlu0 }
 0x173   : > { %1020 = vmatprep.mubr.msk.bf16.mxu1 %vm493_vm3, %v487_v41 }
 0x176   : > { %v488_v42 = vpop.trf.xlu0 }
 0x177   : > { %1021 = vmatmul.mubr.msk.bf16.gmra.mrb[4].mxu1 %vm493_vm3, %v488_v42 }
 0x17a   : > { %v489_v43 = vpop.trf.xlu0 }
 0x17b   : > { %1024 = vmatprep.mubr.msk.bf16.mxu1 %vm493_vm3, %v489_v43 }
 0x17e   : > { %v490_v44 = vpop.trf.xlu0 }
 0x17f   : > { %1025 = vmatmul.mubr.msk.bf16.gmra.mrb[8].mxu1 %vm493_vm3, %v490_v44 }
 0x182   : > { %v491_v45 = vpop.trf.xlu0 }
 0x183   : > { %1028 = vmatprep.mubr.msk.bf16.mxu1 %vm493_vm3, %v491_v45 }
 0x186   : > { %v492_v46 = vpop.trf.xlu0 }
 0x187   : > { %1029 = vmatmul.mubr.msk.bf16.gmra.mrb[12].mxu1 %vm493_vm3, %v492_v46 }
 0x188   : > { %1048 = vmatprep.mubr.bf16.mxu1 %v1103_v36 }
 0x242   : > { %v1018_v47 = vpop.f32.mrb[0].mxu1 }
 0x243   : > { %v552_v48 = vpop.f32.mrb[1].mxu1  ;;  %v1296_v58 = vadd.f32 %v1018_v47, %v463_v51 }
 0x244   : > { %v1019_v49 = vpop.f32.mrb[2].mxu1  ;;  %v1306_v63 = vadd.f32 %v552_v48, %v461_v53 }
 0x245   : > { %v555_v50 = vpop.f32.mrb[3].mxu1  ;;  %v1310_v2 = vadd.f32 %v1019_v49, %v464_v55 }
 0x246   : > { %v1316_v6 = vadd.f32 %v555_v50, %v462_v59 }
 0x24a   : > { %v1022_v56 = vpop.f32.mrb[4].mxu1 }
 0x24b   : > { %v1301_v60 = vadd.f32 %v1022_v56, %v467_v52  ;;  %v568_v61 = vpop.f32.mrb[5].mxu1 }
 0x24c   : > { %v1308_v0 = vadd.f32 %v568_v61, %v465_v54  ;;  %v1023_v1 = vpop.f32.mrb[6].mxu1 }
 0x24d   : > { %v617_v3 = vmax.f32 %v1296_v58, %v1301_v60  ;;  %v1314_v4 = vadd.f32 %v1023_v1, %v468_v57  ;;  %v571_v5 = vpop.f32.mrb[7].mxu1 }
 0x24e   : > { %v615_v7 = vmax.f32 %v1306_v63, %v1308_v0  ;;  %v1320_v8 = vadd.f32 %v571_v5, %v466_v62 }
 0x24f   : > { %v618_v9 = vmax.f32 %v1310_v2, %v1314_v4 }
 0x250   : > { %v616_v10 = vmax.f32 %v1316_v6, %v1320_v8 }
 0x252   : > { %v1026_v13 = vpop.f32.mrb[8].mxu1 }
 0x253   : > { %v1335_v15 = vadd.f32 %v1026_v13, %v471_v11  ;;  %v584_v16 = vpop.f32.mrb[9].mxu1 }
 0x254   : > { %v1340_v18 = vadd.f32 %v584_v16, %v469_v12  ;;  %v1027_v19 = vpop.f32.mrb[10].mxu1 }
 0x255   : > { %v621_v20 = vmax.f32 %v617_v3, %v1335_v15  ;;  %v1343_v21 = vadd.f32 %v1027_v19, %v472_v14  ;;  %v587_v22 = vpop.f32.mrb[11].mxu1 }
 0x256   : > { %v619_v23 = vmax.f32 %v615_v7, %v1340_v18  ;;  %v1346_v24 = vadd.f32 %v587_v22, %v470_v17 }
 0x257   : > { %v622_v25 = vmax.f32 %v618_v9, %v1343_v21 }
 0x258   : > { %v620_v26 = vmax.f32 %v616_v10, %v1346_v24 }
 0x25a   : > { %v1030_v29 = vpop.f32.mrb[12].mxu1 }
 0x25b   : > { %v1360_v31 = vadd.f32 %v1030_v29, %v475_v27  ;;  %v600_v32 = vpop.f32.mrb[13].mxu1 }
 0x25c   : > { %v1372_v34 = vadd.f32 %v600_v32, %v473_v28  ;;  %v1031_v35 = vpop.f32.mrb[14].mxu1 }
 0x25d   : > { %v625_v37 = vmax.f32 %v621_v20, %v1360_v31  ;;  %v1376_v38 = vadd.f32 %v1031_v35, %v476_v30  ;;  %v603_v39 = vpop.f32.mrb[15].mxu1 }
 0x25e   : > { %v623_v40 = vmax.f32 %v619_v23, %v1372_v34  ;;  %v1379_v41 = vadd.f32 %v603_v39, %v474_v33 }
 0x25f   : > { %v626_v42 = vmax.f32 %v622_v25, %v1376_v38 }
 0x260   : > { %v624_v43 = vmax.f32 %v620_v26, %v1379_v41 }
 0x261   : > { %v628_v44 = vmax.f32 %v625_v37, %v626_v42 }
 0x262   : > { %v627_v45 = vmax.f32 %v623_v40, %v624_v43 }
 0x264   : > { %v629_v46 = vmax.f32 %v627_v45, %v628_v44 }
 0x266   : > { %v630_v47 = vrot.slane %v629_v46, 4 }
 0x268   : > { %v631_v48 = vmax.f32 %v629_v46, %v630_v47 }
 0x26a   : > { %v632_v49 = vrot.slane %v631_v48, 2 }
 0x26c   : > { %v633_v50 = vmax.f32 %v631_v48, %v632_v49 }
 0x26e   : > { %v634_v51 = vrot.slane %v633_v50, 1 }
 0x270   : > { %v635_v52 = vmax.f32 %v633_v50, %v634_v51 }
 0x272   : > { %v636_v53 = vsub.f32 %v1306_v63, %v635_v52  ;;  %v637_v54 = vsub.f32 %v1316_v6, %v635_v52  ;;  %v638_v55 = vsub.f32 %v1296_v58, %v635_v52  ;;  %v639_v56 = vsub.f32 %v1310_v2, %v635_v52 }
 0x273   : > { %v640_v57 = vsub.f32 %v1308_v0, %v635_v52  ;;  %v641_v59 = vsub.f32 %v1320_v8, %v635_v52  ;;  %v642_v61 = vsub.f32 %v1301_v60, %v635_v52  ;;  %v643_v62 = vsub.f32 %v1314_v4, %v635_v52 }
 0x274   : > { %v644_v1 = vsub.f32 %v1340_v18, %v635_v52  ;;  %v645_v3 = vsub.f32 %v1346_v24, %v635_v52  ;;  %v646_v63 = vsub.f32 %v1335_v15, %v635_v52  ;;  %v647_v5 = vsub.f32 %v1343_v21, %v635_v52 }
 0x275   : > { %v648_v58 = vsub.f32 %v1372_v34, %v635_v52  ;;  %v649_v2 = vsub.f32 %v1379_v41, %v635_v52  ;;  %v650_v0 = vsub.f32 %v1360_v31, %v635_v52  ;;  %v651_v6 = vsub.f32 %v1376_v38, %v635_v52 }
 0x276   : > { %v652_v7 = vmul.f32 1.442695, %v636_v53  ;;  %v654_v60 = vmul.f32 1.442695, %v637_v54  ;;  %v656_v8 = vmul.f32 1.442695, %v638_v55 }
 0x277   : > { %v658_v4 = vmul.f32 1.442695, %v639_v56  ;;  %v660_v9 = vmul.f32 1.442695, %v640_v57  ;;  %v662_v10 = vmul.f32 1.442695, %v641_v59 }
 0x278   : > { %1105 = vpow2.f32 %v652_v7  ;;  %v664_v11 = vmul.f32 1.442695, %v642_v61  ;;  %v666_v12 = vmul.f32 1.442695, %v643_v62  ;;  %v668_v15 = vmul.f32 1.442695, %v644_v1 }
 0x279   : > { %1107 = vpow2.f32 %v654_v60  ;;  %v670_v18 = vmul.f32 1.442695, %v645_v3  ;;  %v672_v21 = vmul.f32 1.442695, %v646_v63  ;;  %v674_v24 = vmul.f32 1.442695, %v647_v5 }
 0x27a   : > { %1109 = vpow2.f32 %v656_v8  ;;  %v676_v27 = vmul.f32 1.442695, %v648_v58  ;;  %v678_v30 = vmul.f32 1.442695, %v649_v2  ;;  %v680_v33 = vmul.f32 1.442695, %v650_v0 }
 0x27b   : > { %1111 = vpow2.f32 %v658_v4  ;;  %v682_v36 = vmul.f32 1.442695, %v651_v6 }
 0x27c   : > { %1113 = vpow2.f32 %v660_v9 }
 0x27d   : > { %1115 = vpow2.f32 %v662_v10 }
 0x27e   : > { %1117 = vpow2.f32 %v664_v11 }
 0x27f   : > { %1119 = vpow2.f32 %v666_v12 }
 0x280   : > { %1121 = vpow2.f32 %v668_v15 }
 0x281   : > { %1123 = vpow2.f32 %v670_v18 }
 0x282   : > { %v1106_v13 = vpop.eup %1105  ;;  %1125 = vpow2.f32 %v672_v21 }
 0x283   : > { %v1108_v14 = vpop.eup %1107  ;;  %1127 = vpow2.f32 %v674_v24 }
 0x284   : > { %v684_v16 = vadd.f32 %v1108_v14, %v1106_v13  ;;  %v1110_v17 = vpop.eup %1109  ;;  %1129 = vpow2.f32 %v676_v27 }
 0x285   : > { %v1112_v20 = vpop.eup %1111  ;;  %1131 = vpow2.f32 %v678_v30 }
 0x286   : > { %v685_v19 = vadd.f32 %v1110_v17, %v684_v16  ;;  %v1114_v23 = vpop.eup %1113  ;;  %1133 = vpow2.f32 %v680_v33 }
 0x287   : > { %v1116_v26 = vpop.eup %1115  ;;  %1135 = vpow2.f32 %v682_v36 }
 0x288   : > { %v686_v22 = vadd.f32 %v1112_v20, %v685_v19  ;;  %v1118_v29 = vpop.eup %1117  ;;  %v1104_v19 = vld [vmem:[%s1370_s7 + $0x8] sm:$0xff]  }
 0x289   : > { %v1120_v32 = vpop.eup %1119 }
 0x28a   : > { %v687_v25 = vadd.f32 %v1114_v23, %v686_v22  ;;  %v1122_v35 = vpop.eup %1121 }
 0x28b   : > { %v1124_v38 = vpop.eup %1123 }
 0x28c   : > { %v688_v28 = vadd.f32 %v1116_v26, %v687_v25  ;;  %v1126_v40 = vpop.eup %1125 }
 0x28d   : > { %v1128_v42 = vpop.eup %1127 }
 0x28e   : > { %v689_v31 = vadd.f32 %v1118_v29, %v688_v28  ;;  %v1130_v44 = vpop.eup %1129 }
 0x28f   : > { %v1132_v46 = vpop.eup %1131 }
 0x290   : > { %v690_v34 = vadd.f32 %v1120_v32, %v689_v31  ;;  %v1134_v48 = vpop.eup %1133 }
 0x291   : > { %v1136_v50 = vpop.eup %1135 }
 0x292   : > { %v691_v37 = vadd.f32 %v1122_v35, %v690_v34 }
 0x294   : > { %v692_v39 = vadd.f32 %v1124_v38, %v691_v37 }
 0x296   : > { %v693_v41 = vadd.f32 %v1126_v40, %v692_v39 }
 0x298   : > { %v694_v43 = vadd.f32 %v1128_v42, %v693_v41 }
 0x29a   : > { %v695_v45 = vadd.f32 %v1130_v44, %v694_v43 }
 0x29c   : > { %v696_v47 = vadd.f32 %v1132_v46, %v695_v45 }
 0x29e   : > { %v697_v49 = vadd.f32 %v1134_v48, %v696_v47 }
 0x2a0   : > { %v698_v51 = vadd.f32 %v1136_v50, %v697_v49 }
 0x2a2   : > { %v699_v52 = vrot.slane %v698_v51, 4 }
 0x2a4   : > { %v700_v53 = vadd.f32 %v699_v52, %v698_v51 }
 0x2a6   : > { %v701_v54 = vrot.slane %v700_v53, 2 }
 0x2a8   : > { %v702_v55 = vadd.f32 %v701_v54, %v700_v53 }
 0x2aa   : > { %v703_v56 = vrot.slane %v702_v55, 1 }
 0x2ac   : > { %v704_v57 = vadd.f32 %v703_v56, %v702_v55 }
 0x2ae   : > { %1137 = vrcp.f32 %v704_v57 }
 0x2b8   : > { %v1138_v59 = vpop.eup %1137 }
 0x2b9   : > { %v706_v61 = vmul.f32 %v1138_v59, %v1106_v13  ;;  %v707_v62 = vmul.f32 %v1138_v59, %v1108_v14  ;;  %v708_v1 = vmul.f32 %v1138_v59, %v1110_v17  ;;  %v709_v3 = vmul.f32 %v1138_v59, %v1112_v20 }
 0x2ba   : > { %v710_v63 = vmul.f32 %v1138_v59, %v1114_v23  ;;  %v711_v5 = vmul.f32 %v1138_v59, %v1116_v26  ;;  %v712_v58 = vmul.f32 %v1138_v59, %v1118_v29  ;;  %v713_v2 = vmul.f32 %v1138_v59, %v1120_v32 }
 0x2bb   : > { %v722_v0 = vpack.c.bf16 %v707_v62, %v706_v61  ;;  %v723_v6 = vpack.c.bf16 %v709_v3, %v708_v1  ;;  %v714_v7 = vmul.f32 %v1138_v59, %v1122_v35  ;;  %v715_v60 = vmul.f32 %v1138_v59, %v1124_v38 }
 0x2bc   : > { %v724_v8 = vpack.c.bf16 %v711_v5, %v710_v63  ;;  %v725_v4 = vpack.c.bf16 %v713_v2, %v712_v58  ;;  %v716_v9 = vmul.f32 %v1138_v59, %v1126_v40  ;;  %v717_v10 = vmul.f32 %v1138_v59, %v1128_v42 }
 0x2bd   : > { %1032 = vmatprep.subr.bf16.mxu1 %v722_v0  ;;  %v726_v11 = vpack.c.bf16 %v715_v60, %v714_v7  ;;  %v718_v12 = vmul.f32 %v1138_v59, %v1130_v44  ;;  %v719_v15 = vmul.f32 %v1138_v59, %v1132_v46  ;;  %v720_v13 = vmul.f32 %v1138_v59, %v1134_v48 }
 0x2be   : > { %1033 = vmatpush3.bf16.msra.mxu1 %v722_v0  ;;  %v727_v14 = vpack.c.bf16 %v717_v10, %v716_v9  ;;  %v721_v16 = vmul.f32 %v1138_v59, %v1136_v50 }
 0x2bf   : > { %1034 = vmatprep.subr.bf16.mxu1 %v723_v6  ;;  %v728_v17 = vpack.c.bf16 %v719_v15, %v718_v12 }
 0x2c0   : > { %v729_v18 = vpack.c.bf16 %v721_v16, %v720_v13 }
 0x2c2   : > { %1035 = vmatpush3.bf16.msra.mxu1 %v723_v6 }
 0x2c3   : > { %1036 = vmatprep.subr.bf16.mxu1 %v724_v8 }
 0x2c6   : > { %1037 = vmatpush3.bf16.msra.mxu1 %v724_v8 }
 0x2c7   : > { %1038 = vmatprep.subr.bf16.mxu1 %v725_v4 }
 0x2ca   : > { %1039 = vmatpush3.bf16.msra.mxu1 %v725_v4 }
 0x2cb   : > { %1040 = vmatprep.subr.bf16.mxu1 %v726_v11 }
 0x2ce   : > { %1041 = vmatpush3.bf16.msra.mxu1 %v726_v11 }
 0x2cf   : > { %1042 = vmatprep.subr.bf16.mxu1 %v727_v14 }
 0x2d2   : > { %1043 = vmatpush3.bf16.msra.mxu1 %v727_v14 }
 0x2d3   : > { %1044 = vmatprep.subr.bf16.mxu1 %v728_v17 }
 0x2d6   : > { %1045 = vmatpush3.bf16.msra.mxu1 %v728_v17 }
 0x2d7   : > { %1046 = vmatprep.subr.bf16.mxu1 %v729_v18 }
 0x2da   : > { %1047 = vmatpush3.bf16.msra.mxu1 %v729_v18 }
 0x2dd   : > { %1049 = vmatmul.mubr.bf16.vlgmr.msra.gmra.mrb[16].mxu1 %v1104_v19 }
 0x3b0   : > { %v1050_v20 = vpop.f32.mrb[16].mxu1 }
 0x3b1   : > { %v796_v21 = vpop.f32.mrb[17].mxu1 }
 0x3b2   : > { %v1051_v22 = vpop.f32.mrb[18].mxu1 }
 0x3b3   : > { %v992_v23 = vpack.c.bf16 %v1051_v22, %v1050_v20  ;;  %v799_v24 = vpop.f32.mrb[19].mxu1 }
 0x3b4   : > { %v987_v25 = vpack.c.bf16 %v799_v24, %v796_v21 }
 0x3b5   : > { %994 = vst [vmem:[%s282_s10 + $0x8] sm:$0xff] %v992_v23  }
 0x3b6   : > { %988 = vst [vmem:[%s282_s10] sm:$0xff] %v987_v25  }
 0x3b7 PF: > { %s15_s20 = sadd.s32 1, %s1161_s20   ;;  %s1420_s18 = smov %s1157_s19 }
 0x3b8   : > { %p12_p5 = scmp.ge.s32.totalorder %s15_s20, 4   ;;  %s1421_s19 = smov %s1423_s21 }
 0x3ba   :  { %14 = sbr.rel (!%p12_p5) target bundleno = 2 (0x2), region = 77 }

</bundles_post_ra>
